<compile_context>
chip_gen: v5e
topology: v5e:2x2
jax: 0.10.0
libtpu: 0.0.40
codegen_flags: <defaults>
</compile_context>

<pallas_src>
import jax
import jax.numpy as jnp
from jax.experimental import pallas as pl
from jax.experimental.pallas import tpu as pltpu


def downsample_kernel(p_ref, w_ref, shift_ref, o_ref):
    # p_ref:     (1, K, TILE_M) int8  -- spike patches {0,1}, transposed im2col, per image
    # w_ref:     (E, K)         bf16  -- conv weight with eval-BN scale folded in
    # shift_ref: (E, 1)         f32   -- fused BN shift = beta - mean * scale
    # o_ref:     (1, E, TILE_M)       -- lane-dense output block (spatial axis in lanes)
    p = p_ref[0].astype(jnp.bfloat16)                  # int8 -> bf16 (exact for {0,1})
    acc = jnp.dot(w_ref[...], p, preferred_element_type=jnp.float32)   # (E, TILE_M) f32
    o_ref[0] = (acc + shift_ref[...]).astype(o_ref.dtype)


def downsampling_forward(x, weight, gamma, beta, running_mean, running_var,
                         *, stride=2, padding=1, eps=1e-5, tile_m=8192,
                         out_dtype=jnp.float32):
    """x: (1, B, C, H, W) float32 (NCHW with the leading squeeze(0) dim).
    weight: (E, C, k, k) PyTorch Conv2d layout. Returns (1, B, E, Ho, Wo)."""
    assert x.ndim == 5 and x.shape[0] == 1
    assert tile_m % 128 == 0
    _, B, C, H, W = x.shape
    E, Cw, kh_, kw_ = weight.shape
    assert Cw == C and kh_ == kw_
    k = kh_
    Ho = (H + 2 * padding - k) // stride + 1
    Wo = (W + 2 * padding - k) // stride + 1
    M_sp = Ho * Wo
    K = k * k * C

    # ---- wrapper glue: quantize ONCE on the raw activations, store patches as int8. ----
    xs = x[0]                                                    # (B, C, H, W)
    xq = jnp.round(jnp.clip(xs, 0.0, 1.0)).astype(jnp.int8)      # spike quant, once, lossless
    x_pad = jnp.pad(xq, ((0, 0), (0, 0),
                         (padding, padding), (padding, padding)))

    # Per-image M tiling.  Pad M up so every block is a lane-dense multiple of 128
    # (unmasked vst) -- padded columns produce shift-only values, sliced off below.
    if M_sp >= tile_m:
        TILE_M = tile_m
    else:
        TILE_M = -(-M_sp // 128) * 128
    M_pad = -(-M_sp // TILE_M) * TILE_M
    n_m = M_pad // TILE_M

    # Transposed tap-major im2col: rows ordered (kh, kw, c), columns (ho, wo) per image.
    taps = []
    for ih in range(k):
        for iw in range(k):
            win = x_pad[:, :,
                        ih: ih + stride * Ho: stride,
                        iw: iw + stride * Wo: stride]            # (B, C, Ho, Wo)
            taps.append(win.reshape(B, C, M_sp))
    P = jnp.concatenate(taps, axis=1)                            # (B, K, M_sp) int8
    if M_pad != M_sp:
        P = jnp.pad(P, ((0, 0), (0, 0), (0, M_pad - M_sp)))

    # Conv weight (E, C, kh, kw) -> (E, kh, kw, C) -> (E, K); fold eval-BN scale, cast bf16.
    scale = (gamma / jnp.sqrt(running_var + eps)).astype(jnp.float32)          # (E,)
    shift = (beta - running_mean * scale).reshape(E, 1).astype(jnp.float32)    # (E, 1)
    wmat = jnp.transpose(weight, (0, 2, 3, 1)).reshape(E, K)                   # rows = (kh,kw,c)
    wmat = (wmat * scale[:, None]).astype(jnp.bfloat16)                        # (E, K) bf16

    out_itemsize = jnp.dtype(out_dtype).itemsize
    bytes_accessed = (B * K * M_pad * 1                 # int8 patches
                      + E * K * 2 + E * 4               # bf16 weights + f32 shift
                      + B * E * M_pad * out_itemsize)   # output

    out = pl.pallas_call(
        downsample_kernel,
        out_shape=jax.ShapeDtypeStruct((B, E, M_pad), out_dtype),
        grid_spec=pltpu.PrefetchScalarGridSpec(
            num_scalar_prefetch=0,
            grid=(B, n_m),
            in_specs=[
                pl.BlockSpec((1, K, TILE_M), lambda b, m: (b, 0, m)),
                pl.BlockSpec((E, K), lambda b, m: (0, 0)),
                pl.BlockSpec((E, 1), lambda b, m: (0, 0)),
            ],
            out_specs=pl.BlockSpec((1, E, TILE_M), lambda b, m: (b, 0, m)),
        ),
        compiler_params=pltpu.CompilerParams(
            # Disjoint output blocks on both axes; demo grid is (2, 1) so both v7x TCs
            # get a step.  No-op on single-TC v5e/v6e.
            dimension_semantics=("parallel", "parallel"),
            # Double-buffered working set < 3 MiB even at TILE_M=8192 -- well inside the
            # v7x 64 MiB (32 MiB scoped) VMEM; explicit limit leaves sweep headroom.
            vmem_limit_bytes=32 * 1024 * 1024,
        ),
        cost_estimate=pl.CostEstimate(
            flops=2 * B * E * K * M_pad,
            transcendentals=0,
            bytes_accessed=bytes_accessed,
        ),
    )(P, wmat, shift)

    # (B, E, M) -> (B, E, Ho, Wo) is a free reshape (per-image tiles, no transpose),
    # then unsqueeze(0) to restore the module's leading time/reshape dim.
    out = out[:, :, :M_sp].reshape(B, E, Ho, Wo)
    return out[None]


def _reference(x, weight, gamma, beta, running_mean, running_var,
               *, stride=2, padding=1, eps=1e-5):
    xs = jnp.round(jnp.clip(x[0], 0.0, 1.0))
    z = jax.lax.conv_general_dilated(
        xs, weight, window_strides=(stride, stride),
        padding=[(padding, padding), (padding, padding)],
        dimension_numbers=("NCHW", "OIHW", "NCHW"))
    scale = gamma / jnp.sqrt(running_var + eps)
    shift = beta - running_mean * scale
    z = z * scale[None, :, None, None] + shift[None, :, None, None]
    return z[None]


if __name__ == "__main__":
    key = jax.random.PRNGKey(0)
    k_x, k_w, k_g, k_b, k_m, k_v = jax.random.split(key, 6)

    # Small shapes consistent with the module: in_channels=4, embed_dims=32.
    B, C, H, W = 2, 4, 16, 16
    E, ksize, stride, padding = 32, 3, 2, 1

    x = jax.random.uniform(k_x, (1, B, C, H, W), jnp.float32, minval=-0.5, maxval=1.5)

    # Deterministic synthetic parameters (shapes per nn.Conv2d / nn.BatchNorm2d __init__).
    weight = 0.1 * jax.random.normal(k_w, (E, C, ksize, ksize), jnp.float32)
    gamma = 1.0 + 0.1 * jax.random.normal(k_g, (E,), jnp.float32)
    beta = 0.1 * jax.random.normal(k_b, (E,), jnp.float32)
    running_mean = 0.05 * jax.random.normal(k_m, (E,), jnp.float32)
    running_var = 0.5 + jax.random.uniform(k_v, (E,), jnp.float32)

    out = downsampling_forward(x, weight, gamma, beta, running_mean, running_var,
                               stride=stride, padding=padding)
    out = jax.block_until_ready(out)

    ref = _reference(x, weight, gamma, beta, running_mean, running_var,
                     stride=stride, padding=padding)
    assert out.shape == (1, B, E, H // 2, W // 2), out.shape
    # bf16-rounded folded weights -> ~1e-3 absolute deviation from the f32 reference.
    err = float(jnp.max(jnp.abs(out - ref)))
    assert jnp.allclose(out, ref, atol=2e-2, rtol=2e-2), err

    print("KERNEL_OK")
</pallas_src>

<mosaic_0001>
module attributes {stable_mosaic.version = 11 : i64} {
  func.func @downsample_kernel(%arg0: i32, %arg1: i32, %arg2: memref<1x36x128xi8, #tpu.memory_space<vmem>>, %arg3: memref<32x36xbf16, #tpu.memory_space<vmem>>, %arg4: memref<32x1xf32, #tpu.memory_space<vmem>>, %arg5: memref<1x32x128xf32, #tpu.memory_space<vmem>>) attributes {dimension_semantics = [#tpu.dimension_semantics<parallel>, #tpu.dimension_semantics<parallel>], iteration_bounds = array<i64: 2, 1>, scalar_prefetch = 0 : i64, scratch_operands = 0 : i64, tpu.core_type = #tpu.core_type<tc>, window_params = [{transform_indices = @transform_0, window_bounds = array<i64: 1, 36, 128>}, {pipeline_mode = #tpu.pipeline_mode<synchronous>, transform_indices = @transform_1, window_bounds = array<i64: 32, 36>}, {pipeline_mode = #tpu.pipeline_mode<synchronous>, transform_indices = @transform_2, window_bounds = array<i64: 32, 1>}, {transform_indices = @transform_3, window_bounds = array<i64: 1, 32, 128>}]} {
    %c0 = arith.constant 0 : index
    %c0_0 = arith.constant 0 : index
    %c0_1 = arith.constant 0 : index
    %0 = vector.load %arg2[%c0, %c0_0, %c0_1] : memref<1x36x128xi8, #tpu.memory_space<vmem>>, vector<1x36x128xi8>
    %1 = vector.shape_cast %0 : vector<1x36x128xi8> to vector<36x128xi8>
    %2 = arith.sitofp %1 : vector<36x128xi8> to vector<36x128xbf16>
    %c0_2 = arith.constant 0 : index
    %c0_3 = arith.constant 0 : index
    %3 = vector.load %arg3[%c0_2, %c0_3] : memref<32x36xbf16, #tpu.memory_space<vmem>>, vector<32x36xbf16>
    %cst = arith.constant dense<0.000000e+00> : vector<32x128xf32>
    %4 = tpu.matmul %3, %2, %cst {dimension_numbers = #tpu.dot_dimension_numbers<[1], [0], [0], [1], [0, 0, 1, 1], [], []>} : vector<32x36xbf16>, vector<36x128xbf16>, vector<32x128xf32> -> vector<32x128xf32>
    %c0_4 = arith.constant 0 : index
    %c0_5 = arith.constant 0 : index
    %5 = vector.load %arg4[%c0_4, %c0_5] : memref<32x1xf32, #tpu.memory_space<vmem>>, vector<32x1xf32>
    %6 = vector.broadcast %5 : vector<32x1xf32> to vector<32x128xf32>
    %7 = arith.addf %4, %6 : vector<32x128xf32>
    %c0_6 = arith.constant 0 : index
    %c0_7 = arith.constant 0 : index
    %c0_8 = arith.constant 0 : index
    %8 = vector.load %arg5[%c0_6, %c0_7, %c0_8] : memref<1x32x128xf32, #tpu.memory_space<vmem>>, vector<1x32x128xf32>
    %9 = vector.shape_cast %8 : vector<1x32x128xf32> to vector<32x128xf32>
    %10 = vector.shape_cast %7 : vector<32x128xf32> to vector<1x32x128xf32>
    tpu.vector_store %arg5[%c0_6, %c0_7, %c0_8], %10 {strides = array<i32>} : memref<1x32x128xf32, #tpu.memory_space<vmem>>, vector<1x32x128xf32>,
    return
  }
  func.func @transform_0(%arg0: i32, %arg1: i32) -> (i32, i32, i32) {
    %c0_i32 = arith.constant 0 : i32
    %c0_i32_0 = arith.constant 0 : i32
    return %arg0, %c0_i32, %arg1 : i32, i32, i32
  }
  func.func @transform_1(%arg0: i32, %arg1: i32) -> (i32, i32) {
    %c0_i32 = arith.constant 0 : i32
    %c0_i32_0 = arith.constant 0 : i32
    %c0_i32_1 = arith.constant 0 : i32
    return %c0_i32, %c0_i32_0 : i32, i32
  }
  func.func @transform_2(%arg0: i32, %arg1: i32) -> (i32, i32) {
    %c0_i32 = arith.constant 0 : i32
    %c0_i32_0 = arith.constant 0 : i32
    %c0_i32_1 = arith.constant 0 : i32
    return %c0_i32, %c0_i32_0 : i32, i32
  }
  func.func @transform_3(%arg0: i32, %arg1: i32) -> (i32, i32, i32) {
    %c0_i32 = arith.constant 0 : i32
    %c0_i32_0 = arith.constant 0 : i32
    return %arg0, %c0_i32, %arg1 : i32, i32, i32
  }
}

</mosaic_0001>

<bundles_post_ra>
// kernel: tpu_custom_call.1
= control target key start
LH: loop header
LB: loop body
LE: loop exit
PB: predicated region body
PF: predicated region fallthrough
CT: control target
= control target key end

     0   :  { %8 = vsyncpa [#allocation3], 0  ;;  %s774_s0 = inlined_call_operand.vmem [shape: s8[2,36,128], index: 0, kind: input, shape index: {}]   ;;  %s775_s1 = inlined_call_operand.hbm [shape: bf16[32,36], index: 1, kind: input, shape index: {}]   ;;  %s776_s2 = inlined_call_operand.vmem [shape: f32[32,1], index: 2, kind: input, shape index: {}]   ;;  %s777_s3 = inlined_call_operand.hbm [shape: f32[2,32,128], index: 3, kind: output, shape index: {}]  }
   0x1   :  { %9 = vsyncpa [#allocation4], 0 }
   0x2   :  { %11 = vsyncpa [#allocation4 + $0x1], 0  ;;  %s662_s12 = smov 0   ;;  %s664_s13 = smov 0  }
   0x3   :  { %s666_s14 = smov 0   ;;  %s668_s15 = smov 0  }
   0x4   :  { %s670_s16 = smov 0   ;;  %s672_s17 = smov 0  }
   0x5 LB: > { %s409_s18 = sadd.s32 4294967295, %s634_s17   ;;  %s410_s19 = sadd.s32 4294967294, %s634_s17   ;;  %s634_s17 = sphi %s672_s17, %s17_s17   ;;  %s630_s16 = sphi %s670_s16, %s784_s16   ;;  %s626_s15 = sphi %s668_s15, %s783_s15   ;;  %s622_s14 = sphi %s666_s14, %s782_s14   ;;  %s618_s13 = sphi %s664_s13, %s781_s13   ;;  %s614_s12 = sphi %s662_s12, %s780_s12  }
   0x6   : > { %s29_s20 = sadd.s32 1, %s630_s16  ;;  %s108_s21 = sadd.s32 1, %s622_s14 }
   0x7   : > { %p31_p0 = scmp.ge.s32.totalorder %s29_s20, 2  ;;  %p118_p1 = scmp.ne.s32.totalorder %s622_s14, %s618_s13 }
   0x8   : > { %p119_p2 = scmp.eq.s32.totalorder %s409_s18, 1  ;;  %p124_p3 = scmp.ne.s32.totalorder %s618_s13, %s614_s12 }
   0x9   : > { %s786_s20 = smov (%p31_p0, %s29_s20), 0  ;;  %p125_p5 = scmp.eq.s32.totalorder %s410_s19, 1 }
   0xa   : > { %p702_p4 = por %p119_p2, %p118_p1  ;;  %s103_s23 = ssub.s32 %s630_s16, %s786_s20 }
   0xb   : > { %p411_p6 = scmp.ge.s32.totalorder %s634_s17, 1  ;;  %p106_p7 = scmp.eq.s32.totalorder %s103_s23, 0 }
   0xc   : > { %p709_p8 = por %p125_p5, %p124_p3  ;;  %p132_p9 = scmp.lt.s32.totalorder %s634_s17, 3 }
   0xd   : > { %s715_s25 = scalar_select %p106_p7, %s622_s14, %s108_s21  }
   0xe   : > { %p133_p10 = pnand %p411_p6, %p132_p9  ;;  %p463_p11 = scmp.eq.s32.totalorder %s409_s18, 0 }
   0xf   : > { %s143_s28 = sshll.u32 %s775_s1, 4  ;;  %s636_s29 = smov [#allocation2]   ;;  %s144_s28 = int_to_ptr.hbm [resolvable:$true] %s143_s28 }
  0x10   : > { %p455_p12 = pneg %p133_p10  ;;  %s145_s30 = sshll.u32 %s636_s29, 4  ;;  %s146_s30 = int_to_ptr.vmem [resolvable:$true] %s145_s30 }
  0x11   : > { %s637_s4 = smov 64   ;;  %s638_s5 = smov 4  }
  0x12   : > { %p456_p13 = pnand %p463_p11, %p455_p12  ;;  %175 = sbr.rel (%p133_p10) target bundleno = 191 (0xbf), region = 32 }
  0x14   : > { %458 = dma.hbm_to_vmem [thread:$0]  (!%p456_p13), %s144_s28, 256, %s146_s30, [#allocation3], %s637_s4, %s637_s4, %s638_s5  }
  0x17   : > { %605 = dma.done.wait (%p463_p11), [#allocation3], 256  }
  0x18   : > { %607 = vsyncadd (%p463_p11), [#allocation3], 4294967040  ;;  %p203_p0 = scmp.lt.s32.totalorder %s626_s15, 1  ;;  %v639_v0 = vmov 0   ;;  %v236_v6 = vld [vmem:[%s776_s2 + $0x10] sm:$0xff]  ;;  %v234_v7 = vld [vmem:[%s776_s2] sm:$0xff] }
  0x19   : > { %521 = vset.pattern.permute.xlu1 %v639_v0  ;;  %520 = vset.pattern.permute.xlu0 %v639_v0  ;;  %vm275_vm0 = vcmask 1041408   ;;  %v237_v15 = vld [vmem:[%s776_s2 + $0x18] sm:$0xff]  ;;  %v235_v16 = vld [vmem:[%s776_s2 + $0x8] sm:$0xff]  ;;  %v433_v21 = vld [vmem:[#allocation2] sm:$0xff]  ;;  %vm268_vm1 = vcmask 293888   ;;  %s200_s29 = sand.u32 1, %s618_s13  }
  0x1a   : > { %s204_s6 = scalar_select %p203_p0, %s626_s15, 1  ;;  %250 = vperm.xlu1 %521, %v236_v6   ;;  %240 = vperm.xlu0 %520, %v234_v7   ;;  %v434_v22 = vld [vmem:[#allocation2 + $0x8] sm:$0xff] }
  0x1b   : > { %s416_s30 = sshll.u32 %s200_s29, 5  ;;  %s435_s4 = sshll.u32 %s626_s15, 5 }
  0x1c   : > { %s448_s7 = smul.u32 10, %s204_s6  ;;  %s202_s5 = scalar_lea.vmem [#allocation5], %s416_s30 }
  0x1d   : > { %s315_s8 = scalar_lea.hbm %s777_s3, %s435_s4  ;;  %s316_s9 = sshll.u32 %s202_s5, 4  ;;  %s317_s9 = int_to_ptr.vmem [resolvable:$true] %s316_s9 }
  0x1e   : > { %s210_s10 = scalar_lea.vmem %s774_s0, %s448_s7  ;;  %s303_s15 = scalar_lea.sflag [#allocation4], %s200_s29 }
  0x1f   : > { %v216_v1 = vld [vmem:[%s210_s10 + $0x8] sm:$0x1]  ;;  %v447_v2 = vld [vmem:[%s210_s10] sm:$0xff]   ;;  %s318_s10 = sshll.u32 %s315_s8, 4  ;;  %s572_s23 = scalar_lea.hbm %s777_s3, 64  ;;  %s319_s10 = int_to_ptr.hbm [resolvable:$true] %s318_s10 }
  0x20   : > { %v221_v3 = vunpack.c.0.s8 %v216_v1  ;;  %v442_v4 = vunpack.c.2.s8 %v447_v2  ;;  %v443_v5 = vunpack.c.3.s8 %v447_v2  ;;  %v438_v11 = vunpack.c.0.s8 %v447_v2  ;;  %s566_s11 = sshra.s32 %s319_s10, 4  ;;  %s567_s11 = int_to_ptr.hbm [resolvable:$true] %s566_s11 }
  0x21   : > { %v439_v12 = vunpack.c.1.s8 %v447_v2  ;;  %s568_s18 = scalar_lea.hbm %s567_s11, 32  ;;  %p573_p5 = scmp.lt.s32.totalorder %s567_s11, %s777_s3 }
  0x22   : > { %v226_v8 = vcvt.s32.f32 %v221_v3  ;;  %v224_v9 = vcvt.s32.f32 %v442_v4  ;;  %v225_v10 = vcvt.s32.f32 %v443_v5  ;;  %v222_v18 = vcvt.s32.f32 %v438_v11  ;;  %255 = vperm.xlu1 %521, %v237_v15   ;;  %245 = vperm.xlu0 %520, %v235_v16   ;;  %p569_p1 = scmp.ne.s32.totalorder %s567_s11, %s568_s18  ;;  %p574_p6 = scmp.lt.s32.totalorder %s572_s23, %s568_s18 }
  0x23   : > { %v223_v19 = vcvt.s32.f32 %v439_v12 }
  0x24   : > { %v229_v13 = vpack.c.bf16 %v226_v8, %v226_v8  ;;  %v228_v17 = vpack.c.bf16 %v225_v10, %v224_v9  ;;  %p570_p2 = pnand %p569_p1, %p702_p4  ;;  %p575_p7 = por %p574_p6, %p573_p5 }
  0x25   : > { %v227_v20 = vpack.c.bf16 %v223_v19, %v222_v18 }
  0x26   : > { %v277_v14 = vsel %vm275_vm0, %v229_v13, 0  ;;  %p571_p3 = pneg %p570_p2 }
  0x27   : > { %284 = vmatpush.bf16.msra.mxu0 %v277_v14  ;;  %444 = vmatpush.bf16.msra.mxu1 %v277_v14 }
  0x28   : > { %p576_p9 = pnand %p575_p7, %p571_p3 }
  0x2b   : > { %285 = vmatpush.bf16.msra.mxu0 %v228_v17  ;;  %445 = vmatpush.bf16.msra.mxu1 %v228_v17 }
  0x2f   : > { %286 = vmatpush.bf16.msra.mxu0 %v227_v20  ;;  %446 = vmatpush.bf16.msra.mxu1 %v227_v20 }
  0x32   : > { %426 = vmatmul.msk.bf16.vlgmr.msra.gmra.mxu0 %vm268_vm1, %v433_v21  ;;  %427 = vmatmul.msk.bf16.vlgmr.msra.gmra.mxu1 %vm268_vm1, %v434_v22 }
  0x8c   : > { %v251_v23 = vpop.permute.xlu1 %250  ;;  %v241_v24 = vpop.permute.xlu0 %240 }
  0x94   : > { %v256_v29 = vpop.permute.xlu1 %255  ;;  %v246_v30 = vpop.permute.xlu0 %245 }
  0xaf   : > { %v288_v25 = vpop.f32.mrf.mxu0  ;;  %v293_v26 = vpop.f32.mrf.mxu1 }
  0xb0   : > { %v289_v27 = vadd.f32 %v288_v25, %v241_v24  ;;  %v294_v28 = vadd.f32 %v293_v26, %v251_v23 }
  0xb2   : > { %298 = vst [vmem:[%s202_s5] sm:$0xff] %v289_v27 }
  0xb3   : > { %300 = vst [vmem:[%s202_s5 + $0x10] sm:$0xff] %v294_v28 }
  0xb7   : > { %v290_v31 = vpop.f32.mrf.mxu0  ;;  %v295_v32 = vpop.f32.mrf.mxu1 }
  0xb8   : > { %v291_v33 = vadd.f32 %v290_v31, %v246_v30  ;;  %v296_v34 = vadd.f32 %v295_v32, %v256_v29 }
  0xba   : > { %299 = vst [vmem:[%s202_s5 + $0x8] sm:$0xff] %v291_v33 }
  0xbb   : > { %301 = vst [vmem:[%s202_s5 + $0x18] sm:$0xff] %v296_v34 }
  0xbc   : > { %579 = shalt.err (!%p576_p9)
}
  0xbd   : > { %s640_s28 = smov 128   ;;  %s641_s29 = smov 8  }
  0xbe   : > { %453 = dma.vmem_to_hbm [thread:$0]  (%p702_p4), %s317_s9, 512, %s319_s10, %s303_s15, %s640_s28, %s640_s28, %s641_s29  }
  0xbf PF: > { %p465_p10 = scmp.ge.s32.totalorder %s634_s17, 2  ;;  %s333_s30 = sand.u32 1, %s614_s12  }
  0xc0   : > { %s334_s4 = scalar_lea.sflag [#allocation4], %s333_s30 }
  0xc1   : > { %p460_p11 = pnand %p465_p10, %p709_p8 }
  0xc3   : > { %p461_p12 = pneg %p460_p11 }
  0xc5   : > { %609 = dma.done.wait (%p461_p12), %s334_s4, 512  }
  0xc6   : > { %611 = vsyncadd (%p461_p12), %s334_s4, 4294966784  ;;  %s17_s17 = sadd.s32 1, %s634_s17   ;;  %s780_s12 = smov %s618_s13 }
  0xc7   : > { %p14_p13 = scmp.ge.s32.totalorder %s17_s17, 4   ;;  %s781_s13 = smov %s622_s14 }
  0xc8   : > { %s782_s14 = smov %s715_s25  ;;  %s783_s15 = smov %s630_s16 }
  0xc9   : > { %s784_s16 = smov %s786_s20  ;;  %16 = sbr.rel (!%p14_p13) target bundleno = 5 (0x5), region = 72 }
  0xce   :  { %340 = vsyncpa [#allocation3], 1 }
  0xcf   :  { %342 = vsyncpa [#allocation3 + $0x1], 1 }
  0xd0   :  { %343 = vsyncpa [#allocation4], 1 }
  0xd1   :  { %345 = vsyncpa [#allocation4 + $0x1], 1 }

</bundles_post_ra>
